<compile_context>
chip_gen: v6e
topology: v6e:2x2x1
jax: 0.10.0
libtpu: 0.0.40
codegen_flags: <defaults>
</compile_context>

<pallas_src>
import functools

import jax
import jax.numpy as jnp
from jax.experimental import pallas as pl
from jax.experimental.pallas import tpu as pltpu


def _round_up(x, m):
    return ((x + m - 1) // m) * m


# --------------------------------------------------------------------------- #
# Kernel
# --------------------------------------------------------------------------- #
def _tan2016_attention_kernel(*refs, has_mask, valid_len):
    if has_mask:
        (seq_ref, fixed_ref, mask_ref,
         wdec_ref, wenc_ref, wv_ref, ctx_ref, attn_ref) = refs
    else:
        (seq_ref, fixed_ref,
         wdec_ref, wenc_ref, wv_ref, ctx_ref, attn_ref) = refs
        mask_ref = None

    BB, S, D = seq_ref.shape           # batch block, (padded) seq len, input size
    H = wenc_ref.shape[1]              # hidden size

    seq3 = seq_ref[...]                              # (BB, S, D)
    seq2d = seq3.reshape(BB * S, D)                  # free: wrapper pads S % 8 == 0

    # ---- projections on the MXU, f32 accumulation --------------------------
    enc = jnp.dot(seq2d, wenc_ref[...],
                  preferred_element_type=jnp.float32).reshape(BB, S, H)
    dec = jnp.dot(fixed_ref[...], wdec_ref[...],
                  preferred_element_type=jnp.float32)          # (BB, H)

    # broadcast-add the decoder term across the S positions (sublane broadcast)
    x3 = jnp.tanh(enc + dec[:, None, :])                        # (BB, S, H) f32

    # ---- similarity: wv reduction over H (VPU multiply + lane reduce) ------
    wv_b = wv_ref[...].reshape(1, 1, H).astype(jnp.float32)
    scores = jnp.sum(x3 * wv_b, axis=-1)                        # (BB, S)

    if mask_ref is not None:
        scores = scores + (1.0 - mask_ref[...]) * -10000.0
    if valid_len < S:
        # S was padded in the wrapper: give padded columns zero softmax weight.
        col = jax.lax.broadcasted_iota(jnp.int32, (BB, S), 1)
        scores = jnp.where(col < valid_len, scores, -1e30)

    # ---- numerically stable softmax along lanes, exact divide --------------
    m = jnp.max(scores, axis=-1, keepdims=True)
    e = jnp.exp(scores - m)
    denom = jnp.sum(e, axis=-1, keepdims=True)
    p = e / denom                                                # (BB, S)

    attn_ref[...] = p                                            # lane-dense store

    # ---- context = attention-weighted sum of sequence rows -----------------
    ctx_ref[...] = jnp.sum(seq3 * p[:, :, None], axis=1)         # (BB, D) f32


# --------------------------------------------------------------------------- #
# Batch-block selection from a generation-aware VMEM budget
# --------------------------------------------------------------------------- #
def _vmem_footprint(bb, S, D, H, has_mask, in_bytes):
    """Approximate per-step VMEM bytes for a batch block of `bb` rows."""
    Dl = _round_up(D, 128)
    Hl = _round_up(H, 128)
    Sl = _round_up(S, 128)
    D8 = _round_up(D, 8)
    # double-buffered pipeline blocks
    blocks = 2 * bb * S * Dl * in_bytes            # sequence
    blocks += 2 * bb * Dl * in_bytes               # fixed representation
    if has_mask:
        blocks += 2 * bb * Sl * 4                  # mask
    blocks += 2 * bb * Dl * 4 + 2 * bb * Sl * 4    # ctx / attn outputs
    # single-buffered grid-invariant weights
    weights = 2 * D8 * Hl * in_bytes + 8 * Hl * 4
    # main f32 intermediates (enc, x3, x*wv product, seq*p, softmax temps)
    interm = (4 * bb * S * Hl + bb * S * Dl + 6 * bb * Sl + 2 * bb * Hl) * 4
    return blocks + weights + interm


def _pick_batch_block(B, S, D, H, has_mask, budget, in_bytes):
    """Largest multiple-of-8 batch block fitting `budget`, capped so the grid
    has at least 2 steps on big batches (both TensorCores on megacore parts)."""
    B8 = _round_up(max(B, 1), 8)
    if B8 <= 8:
        return 8
    cap = min(max(8, ((B8 // 2) // 8) * 8), 2048)
    best = 8
    bb = 8
    while bb <= cap:
        if _vmem_footprint(bb, S, D, H, has_mask, in_bytes) <= budget:
            best = bb
        bb += 8
    return best


def _invariant_spec(block_shape):
    """Grid-invariant BlockSpec; single-buffered where the API supports it."""
    index_map = lambda b: (0,) * len(block_shape)
    try:
        return pl.BlockSpec(block_shape, index_map, pipeline_mode=pl.Buffered(1))
    except Exception:  # older API without pipeline_mode
        return pl.BlockSpec(block_shape, index_map)


# --------------------------------------------------------------------------- #
# Wrapper
# --------------------------------------------------------------------------- #
def tan2016_attention(sequence, fixed_representation, w_dec, w_enc, w_v,
                      mask=None, batch_block=None, use_bf16=False):
    """sequence (B,S,D), fixed (B,1,D) or (B,D), W_* stored so y = x @ W
    ((D,H)), w_v (H,1).  Returns (context (B,1,D), attention (B,1,S)) in f32."""
    B, S, D = sequence.shape
    H = w_dec.shape[1]
    has_mask = mask is not None

    in_dtype = jnp.bfloat16 if use_bf16 else jnp.float32
    in_bytes = 2 if use_bf16 else 4

    # ---- per-generation VMEM sizing ----------------------------------------
    try:
        phys = getattr(pltpu.get_tpu_info(), "vmem_capacity_bytes", None)
    except Exception:
        phys = None
    if not phys:
        phys = 64 * 1024 * 1024                       # conservative (v7x-sized)
    vmem_limit = min((phys * 3) // 4, 100 * 1024 * 1024)   # ~48 MiB v7x, ~96 MiB v5e/v6e
    budget = (vmem_limit * 4) // 5

    # ---- padding / batch-block selection ------------------------------------
    S_pad = _round_up(S, 8)            # (BB*S, D) leading-dim collapse needs S % 8 == 0
    if batch_block is not None:
        BB = _round_up(batch_block, 8)
    else:
        BB = _pick_batch_block(B, S_pad, D, H, has_mask, budget, in_bytes)
    B8 = _round_up(B, 8)
    n_steps = -(-B8 // BB)
    BB = _round_up(-(-B8 // n_steps), 8)   # rebalance to minimize batch padding
    B_pad = n_steps * BB

    seq = sequence.astype(in_dtype)
    if (B_pad, S_pad) != (B, S):
        seq = jnp.pad(seq, ((0, B_pad - B), (0, S_pad - S), (0, 0)))
    fixed2d = fixed_representation.astype(in_dtype).reshape(B, D)
    if B_pad != B:
        fixed2d = jnp.pad(fixed2d, ((0, B_pad - B), (0, 0)))

    operands = [seq, fixed2d]
    in_specs = [
        pl.BlockSpec((BB, S_pad, D), lambda b: (b, 0, 0)),   # sequence block
        pl.BlockSpec((BB, D), lambda b: (b, 0)),             # fixed-rep block
    ]
    if has_mask:
        mask2d = mask.astype(jnp.float32).reshape(B, S)
        mask2d = jnp.pad(mask2d, ((0, B_pad - B), (0, S_pad - S)))
        operands.append(mask2d)
        in_specs.append(pl.BlockSpec((BB, S_pad), lambda b: (b, 0)))
    operands += [w_dec.astype(in_dtype),
                 w_enc.astype(in_dtype),
                 w_v.astype(jnp.float32).reshape(1, H)]
    in_specs += [_invariant_spec((D, H)),     # W_dec (resident, single-buffered)
                 _invariant_spec((D, H)),     # W_enc
                 _invariant_spec((1, H))]     # w_v row

    kernel = functools.partial(_tan2016_attention_kernel,
                               has_mask=has_mask, valid_len=S)

    ctx_pad, attn_pad = pl.pallas_call(
        kernel,
        out_shape=(
            jax.ShapeDtypeStruct((B_pad, D), jnp.float32),
            jax.ShapeDtypeStruct((B_pad, S_pad), jnp.float32),
        ),
        grid_spec=pl.GridSpec(
            grid=(n_steps,),
            in_specs=in_specs,
            out_specs=(
                pl.BlockSpec((BB, D), lambda b: (b, 0)),        # context
                pl.BlockSpec((BB, S_pad), lambda b: (b, 0)),    # attention
            ),
        ),
        compiler_params=pltpu.CompilerParams(
            dimension_semantics=("parallel",),
            vmem_limit_bytes=int(vmem_limit),
        ),
    )(*operands)

    ctx = ctx_pad[:B].reshape(B, 1, D)
    attn = attn_pad[:B, :S].reshape(B, 1, S)
    return ctx, attn


# --------------------------------------------------------------------------- #
# Pure-JAX reference mirroring the PyTorch forward
# --------------------------------------------------------------------------- #
def _reference(sequence, fixed_representation, w_dec, w_enc, w_v, mask=None):
    x = jnp.tanh(fixed_representation @ w_dec + sequence @ w_enc)   # (B, S, H)
    sim = jnp.transpose(x @ w_v, (0, 2, 1))                          # (B, 1, S)
    if mask is not None:
        sim = sim + (1.0 - mask[:, None, :]) * -10000.0
    attn = jax.nn.softmax(sim, axis=-1)                              # (B, 1, S)
    ctx = attn @ sequence                                            # (B, 1, D)
    return ctx, attn


if __name__ == "__main__":
    key = jax.random.PRNGKey(0)

    # ---- case 1: masked, S multiple of 8 ------------------------------------
    B, S, D, H = 2, 8, 16, 32
    k_seq, k_fix, k_wd, k_we, k_wv, k_mask, key = jax.random.split(key, 7)
    sequence = jax.random.normal(k_seq, (B, S, D), dtype=jnp.float32)
    fixed = jax.random.normal(k_fix, (B, 1, D), dtype=jnp.float32)
    bd = 1.0 / jnp.sqrt(jnp.float32(D))
    bh = 1.0 / jnp.sqrt(jnp.float32(H))
    w_dec = jax.random.uniform(k_wd, (D, H), minval=-bd, maxval=bd, dtype=jnp.float32)
    w_enc = jax.random.uniform(k_we, (D, H), minval=-bd, maxval=bd, dtype=jnp.float32)
    w_v = jax.random.uniform(k_wv, (H, 1), minval=-bh, maxval=bh, dtype=jnp.float32)
    mask = (jax.random.uniform(k_mask, (B, S)) > 0.25).astype(jnp.float32)

    ctx, attn = tan2016_attention(sequence, fixed, w_dec, w_enc, w_v, mask=mask)
    jax.block_until_ready((ctx, attn))
    ctx_ref, attn_ref = _reference(sequence, fixed, w_dec, w_enc, w_v, mask=mask)
    assert ctx.shape == (B, 1, D) and attn.shape == (B, 1, S)
    assert jnp.allclose(attn, attn_ref, atol=1e-4, rtol=1e-4)
    assert jnp.allclose(ctx, ctx_ref, atol=1e-4, rtol=1e-4)

    # ---- case 2: mask-free variant, odd B and S (exercises padding) ---------
    B2, S2 = 3, 10
    k_seq2, k_fix2, key = jax.random.split(key, 3)
    sequence2 = jax.random.normal(k_seq2, (B2, S2, D), dtype=jnp.float32)
    fixed2 = jax.random.normal(k_fix2, (B2, 1, D), dtype=jnp.float32)

    ctx2, attn2 = tan2016_attention(sequence2, fixed2, w_dec, w_enc, w_v, mask=None)
    jax.block_until_ready((ctx2, attn2))
    ctx2_ref, attn2_ref = _reference(sequence2, fixed2, w_dec, w_enc, w_v, mask=None)
    assert ctx2.shape == (B2, 1, D) and attn2.shape == (B2, 1, S2)
    assert jnp.allclose(attn2, attn2_ref, atol=1e-4, rtol=1e-4)
    assert jnp.allclose(ctx2, ctx2_ref, atol=1e-4, rtol=1e-4)

    print("KERNEL_OK")
</pallas_src>

<mosaic_0001>
module attributes {stable_mosaic.version = 11 : i64} {
  func.func @_tan2016_attention_kernel(%arg0: i32, %arg1: memref<8x8x16xf32, #tpu.memory_space<vmem>>, %arg2: memref<8x16xf32, #tpu.memory_space<vmem>>, %arg3: memref<8x8xf32, #tpu.memory_space<vmem>>, %arg4: memref<16x32xf32, #tpu.memory_space<vmem>>, %arg5: memref<16x32xf32, #tpu.memory_space<vmem>>, %arg6: memref<1x32xf32, #tpu.memory_space<vmem>>, %arg7: memref<8x16xf32, #tpu.memory_space<vmem>>, %arg8: memref<8x8xf32, #tpu.memory_space<vmem>>) attributes {dimension_semantics = [#tpu.dimension_semantics<parallel>], iteration_bounds = array<i64: 1>, scalar_prefetch = 0 : i64, scratch_operands = 0 : i64, tpu.core_type = #tpu.core_type<tc>, window_params = [{transform_indices = @transform_0, window_bounds = array<i64: 8, 8, 16>}, {transform_indices = @transform_1, window_bounds = array<i64: 8, 16>}, {transform_indices = @transform_2, window_bounds = array<i64: 8, 8>}, {pipeline_mode = #tpu.pipeline_mode<synchronous>, transform_indices = @transform_3, window_bounds = array<i64: 16, 32>}, {pipeline_mode = #tpu.pipeline_mode<synchronous>, transform_indices = @transform_4, window_bounds = array<i64: 16, 32>}, {pipeline_mode = #tpu.pipeline_mode<synchronous>, transform_indices = @transform_5, window_bounds = array<i64: 1, 32>}, {transform_indices = @transform_6, window_bounds = array<i64: 8, 16>}, {transform_indices = @transform_7, window_bounds = array<i64: 8, 8>}]} {
    %c0 = arith.constant 0 : index
    %c0_0 = arith.constant 0 : index
    %c0_1 = arith.constant 0 : index
    %0 = vector.load %arg1[%c0, %c0_0, %c0_1] : memref<8x8x16xf32, #tpu.memory_space<vmem>>, vector<8x8x16xf32>
    %1 = vector.shape_cast %0 : vector<8x8x16xf32> to vector<64x16xf32>
    %c0_2 = arith.constant 0 : index
    %c0_3 = arith.constant 0 : index
    %2 = vector.load %arg5[%c0_2, %c0_3] : memref<16x32xf32, #tpu.memory_space<vmem>>, vector<16x32xf32>
    %cst = arith.constant dense<0.000000e+00> : vector<64x32xf32>
    %3 = tpu.matmul %1, %2, %cst {dimension_numbers = #tpu.dot_dimension_numbers<[1], [0], [0], [1], [0, 0, 1, 1], [], []>} : vector<64x16xf32>, vector<16x32xf32>, vector<64x32xf32> -> vector<64x32xf32>
    %4 = vector.shape_cast %3 : vector<64x32xf32> to vector<8x8x32xf32>
    %c0_4 = arith.constant 0 : index
    %c0_5 = arith.constant 0 : index
    %5 = vector.load %arg2[%c0_4, %c0_5] : memref<8x16xf32, #tpu.memory_space<vmem>>, vector<8x16xf32>
    %c0_6 = arith.constant 0 : index
    %c0_7 = arith.constant 0 : index
    %6 = vector.load %arg4[%c0_6, %c0_7] : memref<16x32xf32, #tpu.memory_space<vmem>>, vector<16x32xf32>
    %cst_8 = arith.constant dense<0.000000e+00> : vector<8x32xf32>
    %7 = tpu.matmul %5, %6, %cst_8 {dimension_numbers = #tpu.dot_dimension_numbers<[1], [0], [0], [1], [0, 0, 1, 1], [], []>} : vector<8x16xf32>, vector<16x32xf32>, vector<8x32xf32> -> vector<8x32xf32>
    %8 = vector.shape_cast %7 : vector<8x32xf32> to vector<8x1x32xf32>
    %9 = vector.broadcast %8 : vector<8x1x32xf32> to vector<8x8x32xf32>
    %10 = arith.addf %4, %9 : vector<8x8x32xf32>
    %11 = math.tanh %10 : vector<8x8x32xf32>
    %c0_9 = arith.constant 0 : index
    %c0_10 = arith.constant 0 : index
    %12 = vector.load %arg6[%c0_9, %c0_10] : memref<1x32xf32, #tpu.memory_space<vmem>>, vector<1x32xf32>
    %13 = vector.shape_cast %12 : vector<1x32xf32> to vector<1x1x32xf32>
    %14 = vector.broadcast %13 : vector<1x1x32xf32> to vector<8x8x32xf32>
    %15 = arith.mulf %11, %14 : vector<8x8x32xf32>
    %cst_11 = arith.constant dense<0.000000e+00> : vector<8x8xf32>
    %16 = vector.multi_reduction <add>, %15, %cst_11 [2] : vector<8x8x32xf32> to vector<8x8xf32>
    %c0_12 = arith.constant 0 : index
    %c0_13 = arith.constant 0 : index
    %17 = vector.load %arg3[%c0_12, %c0_13] : memref<8x8xf32, #tpu.memory_space<vmem>>, vector<8x8xf32>
    %cst_14 = arith.constant 1.000000e+00 : f32
    %18 = vector.broadcast %cst_14 : f32 to vector<8x8xf32>
    %19 = arith.subf %18, %17 : vector<8x8xf32>
    %cst_15 = arith.constant -1.000000e+04 : f32
    %20 = vector.broadcast %cst_15 : f32 to vector<8x8xf32>
    %21 = arith.mulf %19, %20 : vector<8x8xf32>
    %22 = arith.addf %16, %21 : vector<8x8xf32>
    %cst_16 = arith.constant dense<0xFF800000> : vector<8xf32>
    %23 = vector.multi_reduction <maximumf>, %22, %cst_16 [1] : vector<8x8xf32> to vector<8xf32>
    %24 = vector.shape_cast %23 : vector<8xf32> to vector<8x1xf32>
    %25 = vector.broadcast %24 : vector<8x1xf32> to vector<8x8xf32>
    %26 = arith.subf %22, %25 : vector<8x8xf32>
    %27 = math.exp %26 : vector<8x8xf32>
    %cst_17 = arith.constant dense<0.000000e+00> : vector<8xf32>
    %28 = vector.multi_reduction <add>, %27, %cst_17 [1] : vector<8x8xf32> to vector<8xf32>
    %29 = vector.shape_cast %28 : vector<8xf32> to vector<8x1xf32>
    %30 = vector.broadcast %29 : vector<8x1xf32> to vector<8x8xf32>
    %31 = arith.divf %27, %30 : vector<8x8xf32>
    %c0_18 = arith.constant 0 : index
    %c0_19 = arith.constant 0 : index
    %32 = vector.load %arg8[%c0_18, %c0_19] : memref<8x8xf32, #tpu.memory_space<vmem>>, vector<8x8xf32>
    tpu.vector_store %arg8[%c0_18, %c0_19], %31 {strides = array<i32>} : memref<8x8xf32, #tpu.memory_space<vmem>>, vector<8x8xf32>,
    %33 = vector.shape_cast %31 : vector<8x8xf32> to vector<8x8x1xf32>
    %34 = vector.broadcast %33 : vector<8x8x1xf32> to vector<8x8x16xf32>
    %35 = arith.mulf %0, %34 : vector<8x8x16xf32>
    %cst_20 = arith.constant dense<0.000000e+00> : vector<8x16xf32>
    %36 = vector.multi_reduction <add>, %35, %cst_20 [1] : vector<8x8x16xf32> to vector<8x16xf32>
    %c0_21 = arith.constant 0 : index
    %c0_22 = arith.constant 0 : index
    %37 = vector.load %arg7[%c0_21, %c0_22] : memref<8x16xf32, #tpu.memory_space<vmem>>, vector<8x16xf32>
    tpu.vector_store %arg7[%c0_21, %c0_22], %36 {strides = array<i32>} : memref<8x16xf32, #tpu.memory_space<vmem>>, vector<8x16xf32>,
    return
  }
  func.func @transform_0(%arg0: i32) -> (i32, i32, i32) {
    %c0_i32 = arith.constant 0 : i32
    %c0_i32_0 = arith.constant 0 : i32
    %c0_i32_1 = arith.constant 0 : i32
    return %arg0, %c0_i32, %c0_i32_0 : i32, i32, i32
  }
  func.func @transform_1(%arg0: i32) -> (i32, i32) {
    %c0_i32 = arith.constant 0 : i32
    %c0_i32_0 = arith.constant 0 : i32
    return %arg0, %c0_i32 : i32, i32
  }
  func.func @transform_2(%arg0: i32) -> (i32, i32) {
    %c0_i32 = arith.constant 0 : i32
    %c0_i32_0 = arith.constant 0 : i32
    return %arg0, %c0_i32 : i32, i32
  }
  func.func @transform_3(%arg0: i32) -> (i32, i32) {
    %c0_i32 = arith.constant 0 : i32
    %c0_i32_0 = arith.constant 0 : i32
    %c0_i32_1 = arith.constant 0 : i32
    return %c0_i32, %c0_i32_0 : i32, i32
  }
  func.func @transform_4(%arg0: i32) -> (i32, i32) {
    %c0_i32 = arith.constant 0 : i32
    %c0_i32_0 = arith.constant 0 : i32
    %c0_i32_1 = arith.constant 0 : i32
    return %c0_i32, %c0_i32_0 : i32, i32
  }
  func.func @transform_5(%arg0: i32) -> (i32, i32) {
    %c0_i32 = arith.constant 0 : i32
    %c0_i32_0 = arith.constant 0 : i32
    %c0_i32_1 = arith.constant 0 : i32
    return %c0_i32, %c0_i32_0 : i32, i32
  }
  func.func @transform_6(%arg0: i32) -> (i32, i32) {
    %c0_i32 = arith.constant 0 : i32
    %c0_i32_0 = arith.constant 0 : i32
    return %arg0, %c0_i32 : i32, i32
  }
  func.func @transform_7(%arg0: i32) -> (i32, i32) {
    %c0_i32 = arith.constant 0 : i32
    %c0_i32_0 = arith.constant 0 : i32
    return %arg0, %c0_i32 : i32, i32
  }
}

</mosaic_0001>

<bundles_post_ra>
// kernel: tpu_custom_call.1
= control target key start
LH: loop header
LB: loop body
LE: loop exit
PB: predicated region body
PF: predicated region fallthrough
CT: control target
= control target key end

     0   :  { %13 = vsyncpa [#allocation3], 0  ;;  %s1588_s0 = inlined_call_operand.hbm [shape: f32[8,8,16], index: 0, kind: input, shape index: {}]   ;;  %s1589_s1 = inlined_call_operand.hbm [shape: f32[8,16], index: 1, kind: input, shape index: {}]   ;;  %s1590_s2 = inlined_call_operand.hbm [shape: f32[8,8], index: 2, kind: input, shape index: {}]   ;;  %s1591_s3 = inlined_call_operand.hbm [shape: f32[16,32], index: 3, kind: input, shape index: {}]   ;;  %s1592_s4 = inlined_call_operand.hbm [shape: f32[16,32], index: 4, kind: input, shape index: {}]   ;;  %s1593_s5 = inlined_call_operand.vmem [shape: f32[1,32], index: 5, kind: input, shape index: {}]   ;;  %s1594_s6 = inlined_call_operand.hbm [shape: f32[8,16], index: 6, kind: output, shape index: {0}]   ;;  %s1595_s7 = inlined_call_operand.hbm [shape: f32[8,8], index: 7, kind: output, shape index: {1}]  }
   0x1   :  { %14 = vsyncpa [#allocation6], 0 }
   0x2   :  { %15 = vsyncpa [#allocation9], 0 }
   0x3   :  { %16 = vsyncpa [#allocation4], 0 }
   0x4   :  { %17 = vsyncpa [#allocation13], 0  ;;  %s1267_s24 = smov [#allocation5]  }
   0x5   :  { %s36_s25 = sshll.u32 %s1267_s24, 4  ;;  %s37_s25 = int_to_ptr.vmem [resolvable:$true] %s36_s25 }
   0x6   :  { %s1125_s26 = scalar_lea.vmem %s37_s25, 128  ;;  %p1130_p1 = scmp.lt.s32.totalorder %s37_s25, %s37_s25 }
   0x7   :  { %p1126_p0 = scmp.ne.s32.totalorder %s37_s25, %s1125_s26  ;;  %p1131_p2 = scmp.lt.s32.totalorder %s1125_s26, %s1125_s26 }
   0x9   :  { %p1132_p3 = por %p1131_p2, %p1130_p1 }
   0xb   :  { %p1133_p4 = pnand %p1132_p3, %p1126_p0 }
   0xd   :  { %1136 = shalt.err (!%p1133_p4)
}
   0xe   :  { %39 = dma.hbm_to_vmem [thread:$0]  %s1589_s1, 128, %s37_s25, [#allocation6]  }
   0xf   :  { %s1268_s29 = smov [#allocation8]   ;;  %s1269_s8 = smov [#allocation2]  }
  0x10   :  { %s55_s30 = sshll.u32 %s1268_s29, 4  ;;  %s23_s9 = sshll.u32 %s1269_s8, 4  ;;  %s56_s30 = int_to_ptr.vmem [resolvable:$true] %s55_s30  ;;  %s24_s9 = int_to_ptr.vmem [resolvable:$true] %s23_s9 }
  0x11   :  { %s1145_s10 = scalar_lea.vmem %s56_s30, 256  ;;  %p1150_p6 = scmp.lt.s32.totalorder %s56_s30, %s56_s30 }
  0x12   :  { %p1146_p5 = scmp.ne.s32.totalorder %s56_s30, %s1145_s10  ;;  %p1151_p7 = scmp.lt.s32.totalorder %s1145_s10, %s1145_s10 }
  0x14   :  { %p1152_p8 = por %p1151_p7, %p1150_p6 }
  0x16   :  { %p1153_p9 = pnand %p1152_p8, %p1146_p5 }
  0x18   :  { %1156 = shalt.err (!%p1153_p9)
}
  0x19   :  { %s1270_s11 = smov 128   ;;  %s1271_s12 = smov 8  }
  0x1a   :  { %61 = dma.hbm_to_vmem [thread:$0]  %s1591_s3, 256, %s56_s30, [#allocation9], %s1270_s11, %s1270_s11, %s1271_s12  }
  0x1b   :  { %s1165_s1 = scalar_lea.vmem %s24_s9, 1024  ;;  %p1170_p11 = scmp.lt.s32.totalorder %s24_s9, %s24_s9 }
  0x1c   :  { %p1166_p10 = scmp.ne.s32.totalorder %s24_s9, %s1165_s1  ;;  %p1171_p12 = scmp.lt.s32.totalorder %s1165_s1, %s1165_s1 }
  0x1e   :  { %p1172_p13 = por %p1171_p12, %p1170_p11 }
  0x20   :  { %p1173_p0 = pnand %p1172_p13, %p1166_p10 }
  0x22   :  { %1176 = shalt.err (!%p1173_p0)
}
  0x23   :  { %29 = dma.hbm_to_vmem [thread:$0]  %s1588_s0, 1024, %s24_s9, [#allocation3], %s1270_s11, %s1270_s11, %s1271_s12  }
  0x24   :  { %s1272_s17 = smov [#allocation7]   ;;  %s1273_s19 = smov [#allocation10]  }
  0x25   :  { %s46_s18 = sshll.u32 %s1272_s17, 4  ;;  %s67_s3 = sshll.u32 %s1273_s19, 4  ;;  %s47_s18 = int_to_ptr.vmem [resolvable:$true] %s46_s18  ;;  %s68_s3 = int_to_ptr.vmem [resolvable:$true] %s67_s3 }
  0x26   :  { %s1185_s20 = scalar_lea.vmem %s47_s18, 128  ;;  %p1190_p2 = scmp.lt.s32.totalorder %s47_s18, %s47_s18 }
  0x27   :  { %p1186_p1 = scmp.ne.s32.totalorder %s47_s18, %s1185_s20  ;;  %p1191_p3 = scmp.lt.s32.totalorder %s1185_s20, %s1185_s20 }
  0x29   :  { %p1192_p4 = por %p1191_p3, %p1190_p2 }
  0x2b   :  { %p1193_p5 = pnand %p1192_p4, %p1186_p1 }
  0x2d   :  { %1196 = shalt.err (!%p1193_p5)
}
  0x2e   :  { %49 = dma.hbm_to_vmem [thread:$0]  %s1590_s2, 128, %s47_s18, [#allocation6]  }
  0x2f   :  { %s1205_s23 = scalar_lea.vmem %s68_s3, 256  ;;  %p1210_p7 = scmp.lt.s32.totalorder %s68_s3, %s68_s3 }
  0x30   :  { %p1206_p6 = scmp.ne.s32.totalorder %s68_s3, %s1205_s23  ;;  %p1211_p8 = scmp.lt.s32.totalorder %s1205_s23, %s1205_s23 }
  0x32   :  { %p1212_p9 = por %p1211_p8, %p1210_p7 }
  0x34   :  { %p1213_p10 = pnand %p1212_p9, %p1206_p6 }
  0x36   :  { %1216 = shalt.err (!%p1213_p10)
}
  0x37   :  { %73 = dma.hbm_to_vmem [thread:$0]  %s1592_s4, 256, %s68_s3, [#allocation9], %s1270_s11, %s1270_s11, %s1271_s12  }
  0x38   :  { %1257 = dma.done.wait [#allocation3], 1024  }
  0x39   :  { %1258 = vsyncadd [#allocation3], 4294966272 }
  0x3a   :  { %1259 = dma.done.wait [#allocation6], 256  }
  0x3b   :  { %1260 = vsyncadd [#allocation6], 4294967040 }
  0x3c   :  { %1261 = dma.done.wait [#allocation9], 512  }
  0x3d   :  { %1262 = vsyncadd [#allocation9], 4294966784  ;;  %v312_v0 = vlaneseq  ;;  %vm101_vm0 = vcmask 130048   ;;  %v100_v1 = vld [vmem:[#allocation10 + $0x8] sm:$0xff]  ;;  %v99_v2 = vld [vmem:[#allocation10] sm:$0xff]  ;;  %v1274_v9 = vmov 0.0  }
  0x3e   :  { %v1344_v3 = vld [vmem:[#allocation2 + $0x30] sm:$0xff]  ;;  %1050 = vmatprep.subr.mxu1 %v100_v1  ;;  %1027 = vmatprep.subr.mxu0 %v100_v1  ;;  %v1351_v5 = vld [vmem:[#allocation2 + $0x38] sm:$0xff]  ;;  %v1353_v7 = vld [vmem:[#allocation2] sm:$0xff]  ;;  %vm1275_vm1 = vmmov 0   ;;  %v1276_v31 = vmov 1966171168  }
  0x3f   :  { %v1347_v4 = vshrl.u32 %v312_v0, 7  ;;  %1052 = vmatpush3.msra.mxu1 %v100_v1  ;;  %1040 = vmatprep.mubr.msk.f32.mxu1 %vm101_vm0, %v1344_v3  ;;  %v233_v6 = vld [vmem:[#allocation8 + $0x8] sm:$0xff]  ;;  %v453_v8 = vld [vmem:[#allocation7] sm:$0xff]  ;;  %v232_v11 = vld [vmem:[#allocation8] sm:$0xff]  ;;  %v310_v32 = vunpack.c.l.s4 %v1276_v31  ;;  %vm428_vm2 = vcmask 261120   ;;  %vm595_vm3 = vcmask 1041409  }
  0x40   :  { %1051 = vmatprep.subr.mxu1 %v99_v2  ;;  %1028 = vmatpush3.msra.mxu0 %v100_v1  ;;  %v1357_v10 = vld [vmem:[#allocation2 + $0x8] sm:$0xff]  ;;  %v454_v12 = vsub.f32 1.0, %v453_v8  ;;  %v1362_v14 = vld [vmem:[#allocation2 + $0x10] sm:$0xff]  ;;  %v231_v16 = vld [vmem:[#allocation5] sm:$0xff]  ;;  %vm597_vm4 = vcmask 1042434   ;;  %vm599_vm5 = vcmask 1043459  }
  0x41   :  { %1053 = vmatpush3.msra.mxu1 %v99_v2  ;;  %1029 = vmatprep.subr.mxu0 %v99_v2  ;;  %v1360_v13 = vsub.s32 1, %v1347_v4  ;;  %v1365_v15 = vsub.s32 0, %v1347_v4  ;;  %v1372_v18 = vsub.s32 2, %v1347_v4  ;;  %v1377_v19 = vsub.s32 4, %v1347_v4  ;;  %v1381_v20 = vld [vmem:[#allocation2 + $0x18] sm:$0xff]  ;;  %v1386_v22 = vld [vmem:[#allocation2 + $0x20] sm:$0xff] }
  0x42   :  { %1041 = vmatmul.mubr.msk.f32.vlgmr.msra.gmra.mxu1 %vm101_vm0, %v1351_v5  ;;  %1043 = vmatprep.subr.mxu1 %v1274_v9  ;;  %v1369_v17 = vmul.f32 -10000.0, %v454_v12  ;;  %v1393_v25 = vsub.s32 3, %v1347_v4  ;;  %v1401_v27 = vld [vmem:[#allocation2 + $0x28] sm:$0xff]  ;;  %v1406_v29 = vsub.s32 5, %v1347_v4  ;;  %v311_v33 = vunpack.c.0.s8 %v310_v32 }
  0x43   :  { %1044 = vmatpush3.msra.mxu1 %v233_v6  ;;  %1030 = vmatpush3.msra.mxu0 %v99_v2  ;;  %vm601_vm6 = vcmask 1044484   ;;  %vm603_vm7 = vcmask 1045509   ;;  %vm605_vm8 = vcmask 1046534   ;;  %vm607_vm9 = vcmask 1047559  }
  0x44   :  { %1031 = vmatprep.mubr.msk.f32.mxu0 %vm101_vm0, %v1353_v7  ;;  %1045 = vmatprep.subr.mxu1 %v1274_v9  ;;  %v467_v21 = vrot.slane %v1369_v17, %v1360_v13  ;;  %v460_v23 = vrot.slane %v1369_v17, %v1365_v15  ;;  %v474_v24 = vrot.slane %v1369_v17, %v1372_v18  ;;  %vm610_vm10 = vcmask 64512  }
  0x45   :  { %1032 = vmatmul.mubr.msk.f32.vlgmr.msra.gmra.mxu0 %vm101_vm0, %v1357_v10  ;;  %1046 = vmatpush3.msra.mxu1 %v232_v11  ;;  %v488_v26 = vrot.slane %v1369_v17, %v1377_v19  ;;  %v481_v28 = vrot.slane %v1369_v17, %v1393_v25  ;;  %v495_v30 = vrot.slane %v1369_v17, %v1406_v29 }
  0x46   :  { %1047 = vmatprep.mubr.msk.f32.mxu1 %vm1275_vm1, %v1274_v9  ;;  %1034 = vmatprep.mubr.msk.f32.mxu0 %vm101_vm0, %v1362_v14  ;;  %v314_v36 = vsub.s32 %v311_v33, %v1347_v4 }
  0x47   :  { %1048 = vmatmul.mubr.msk.f32.vlgmr.msra.gmra.mxu1 %vm101_vm0, %v231_v16  ;;  %469 = vbcast.lane.b32.xlu1 %v467_v21, 256 }
  0x48   :  { %462 = vbcast.lane.b32.xlu0 %v460_v23, 256 }
  0x49   :  { %1035 = vmatmul.mubr.msk.f32.gmra.mxu0 %vm101_vm0, %v1381_v20 }
  0x4a   :  { %1037 = vmatprep.mubr.msk.f32.mxu0 %vm101_vm0, %v1386_v22 }
  0x4b   :  { %476 = vbcast.lane.b32.xlu1 %v474_v24, 256  ;;  %v1013_v24 = vld [vmem:[%s1593_s5] ss:$0 sm:$0xff]  ;;  %s1278_s5 = smov [#allocation12]  }
  0x4c   :  { %490 = vbcast.lane.b32.xlu0 %v488_v26, 256  ;;  %s989_s25 = sshll.u32 %s1278_s5, 4  ;;  %s990_s25 = int_to_ptr.vmem [resolvable:$true] %s989_s25 }
  0x4d   :  { %1038 = vmatmul.mubr.msk.f32.gmra.mxu0 %vm101_vm0, %v1401_v27  ;;  %s1217_s26 = scalar_lea.vmem %s990_s25, 128  ;;  %p1222_p12 = scmp.lt.s32.totalorder %s990_s25, %s990_s25 }
  0x4e   :  { %p1218_p11 = scmp.ne.s32.totalorder %s990_s25, %s1217_s26  ;;  %p1223_p13 = scmp.lt.s32.totalorder %s1217_s26, %s1217_s26 }
  0x4f   :  { %483 = vbcast.lane.b32.xlu1 %v481_v28, 256 }
  0x50   :  { %p1224_p0 = por %p1223_p13, %p1222_p12 }
  0x52   :  { %p1225_p1 = pnand %p1224_p0, %p1218_p11 }
  0x53   :  { %497 = vbcast.lane.b32.xlu1 %v495_v30, 256 }
 0x102   :  { %v1042_v34 = vpop.f32.mrf.mxu1 }
 0x104   :  { %v222_v35 = vpop.f32.mrf.mxu1 }
 0x105   :  { %v1033_v37 = vpop.f32.mrf.mxu0 }
 0x107   :  { %v303_v38 = vpop.f32.mrf.mxu1  ;;  %v192_v39 = vpop.f32.mrf.mxu0 }
 0x108   :  { %v308_v40 = vcombine.high %v303_v38, %v303_v38  ;;  %v315_v41 = vrot.slane %v303_v38, %v314_v36 }
 0x109   :  { %v1049_v42 = vpop.f32.mrf.mxu1  ;;  %v1036_v43 = vpop.f32.mrf.mxu0 }
 0x10a   :  { %v322_v44 = vrot.slane %v308_v40, %v314_v36  ;;  %v323_v45 = vcombine.high %v315_v41, %v315_v41  ;;  %v331_v46 = vrot.slane %v315_v41, %v314_v36 }
 0x10b   :  { %v202_v47 = vpop.f32.mrf.mxu0 }
 0x10c   :  { %v324_v48 = vcombine.high %v322_v44, %v322_v44  ;;  %v345_v49 = vrot.slane %v323_v45, %v314_v36  ;;  %v360_v50 = vrot.slane %v331_v46, %v1365_v15  ;;  %v353_v51 = vcombine.high %v331_v46, %v331_v46 }
 0x10d   :  { %v1039_v52 = vpop.f32.mrf.mxu0  ;;  %v338_v53 = vrot.slane %v322_v44, %v314_v36 }
 0x10e   :  { %v364_v54 = vrot.slane %v345_v49, %v1365_v15  ;;  %v397_v55 = vadd.f32 %v360_v50, %v192_v39  ;;  %v355_v56 = vcombine.high %v345_v49, %v345_v49  ;;  %v368_v57 = vrot.slane %v353_v51, %v1365_v15 }
 0x10f   :  { %v352_v58 = vrot.slane %v324_v48, %v314_v36  ;;  %v212_v59 = vpop.f32.mrf.mxu0  ;;  %v354_v60 = vcombine.high %v338_v53, %v338_v53  ;;  %v376_v61 = vrot.slane %v338_v53, %v1365_v15  ;;  %v1277_v51 = vmov 0  }
 0x110   :  { %v398_v62 = vadd.f32 %v1033_v37, %v364_v54  ;;  %1069 = vtanh.f32 %v397_v55  ;;  %v372_v63 = vrot.slane %v355_v56, %v1365_v15  ;;  %v399_v1 = vadd.f32 %v368_v57, %v202_v47  ;;  %1067 = vset.pattern.permute.xlu0 %v1277_v51  ;;  %1068 = vset.pattern.permute.xlu1 %v1277_v51  ;;  %v470_v57 = vpop.permute.xlu1 %469 }
 0x111   :  { %v356_v2 = vcombine.high %v352_v58, %v352_v58  ;;  %v380_v6 = vrot.slane %v352_v58, %v1365_v15  ;;  %v384_v8 = vrot.slane %v354_v60, %v1365_v15  ;;  %v401_v11 = vadd.f32 %v376_v61, %v212_v59  ;;  %v463_v59 = vpop.permute.xlu0 %462 }
 0x112   :  { %1071 = vtanh.f32 %v398_v62  ;;  %v400_v9 = vadd.f32 %v1036_v43, %v372_v63  ;;  %v1433_v53 = vsub.s32 7, %v1347_v4  ;;  %v1436_v54 = vsub.s32 6, %v1347_v4 }
 0x113   :  { %1073 = vtanh.f32 %v399_v1  ;;  %v388_v12 = vrot.slane %v356_v2, %v1365_v15  ;;  %v402_v16 = vadd.f32 %v1039_v52, %v380_v6  ;;  %v403_v21 = vadd.f32 %v384_v8, %v222_v35 }
 0x114   :  { %1075 = vtanh.f32 %v400_v9  ;;  %v509_v55 = vrot.slane %v1369_v17, %v1433_v53  ;;  %v502_v56 = vrot.slane %v1369_v17, %v1436_v54  ;;  %v477_v58 = vpop.permute.xlu1 %476 }
 0x115   :  { %1077 = vtanh.f32 %v401_v11  ;;  %v404_v23 = vadd.f32 %v1042_v34, %v388_v12  ;;  %v491_v61 = vpop.permute.xlu0 %490 }
 0x116   :  { %1079 = vtanh.f32 %v402_v16 }
 0x117   :  { %1081 = vtanh.f32 %v403_v21 }
 0x118   :  { %1083 = vtanh.f32 %v404_v23  ;;  %v484_v60 = vpop.permute.xlu1 %483 }
 0x11c   :  { %v498_v62 = vpop.permute.xlu1 %497 }
 0x11d   :  { %v1070_v26 = vpop.eup %1069 }
 0x11e   :  { %v420_v28 = vmul.f32 %v1070_v26, %v1013_v24 }
 0x11f   :  { %v1072_v30 = vpop.eup %1071 }
 0x120   :  { %v1074_v31 = vpop.eup %1073  ;;  %v429_v32 = vsel %vm428_vm2, %v420_v28, 0.0  ;;  %v421_v33 = vmul.f32 %v1072_v30, %v1013_v24 }
 0x121   :  { %v1076_v36 = vpop.eup %1075  ;;  %430 = vadd.xlane.f32.xlu0 %v429_v32  ;;  %v422_v35 = vmul.f32 %v1074_v31, %v1013_v24 }
 0x122   :  { %v1078_v37 = vpop.eup %1077  ;;  %v423_v38 = vmul.f32 %v1076_v36, %v1013_v24  ;;  %v432_v40 = vsel %vm428_vm2, %v421_v33, 0.0  ;;  %v562_v33 = vand.u32 127, %v312_v0 }
 0x123   :  { %v435_v34 = vsel %vm428_vm2, %v422_v35, 0.0  ;;  %v1080_v39 = vpop.eup %1079  ;;  %v424_v41 = vmul.f32 %v1078_v37, %v1013_v24 }
 0x124   :  { %436 = vadd.xlane.f32.xlu1 %v435_v34  ;;  %v1082_v42 = vpop.eup %1081  ;;  %v438_v43 = vsel %vm428_vm2, %v423_v38, 0.0  ;;  %v425_v44 = vmul.f32 %v1080_v39, %v1013_v24  ;;  %v1459_v35 = vsub.s32 %v562_v33, %v1347_v4 }
 0x125   :  { %433 = vadd.xlane.f32.xlu0 %v432_v40  ;;  %v1084_v45 = vpop.eup %1083  ;;  %v441_v46 = vsel %vm428_vm2, %v424_v41, 0.0  ;;  %v426_v47 = vmul.f32 %v1082_v42, %v1013_v24 }
 0x126   :  { %v444_v48 = vsel %vm428_vm2, %v425_v44, 0.0  ;;  %v427_v49 = vmul.f32 %v1084_v45, %v1013_v24 }
 0x127   :  { %v447_v50 = vsel %vm428_vm2, %v426_v47, 0.0 }
 0x128   :  { %439 = vadd.xlane.f32.xlu1 %v438_v43  ;;  %v450_v52 = vsel %vm428_vm2, %v427_v49, 0.0 }
 0x129   :  { %442 = vadd.xlane.f32.xlu0 %v441_v46 }
 0x12c   :  { %445 = vadd.xlane.f32.xlu1 %v444_v48 }
 0x12d   :  { %448 = vadd.xlane.f32.xlu0 %v447_v50 }
 0x130   :  { %451 = vadd.xlane.f32.xlu1 %v450_v52 }
 0x141   :  { %511 = vbcast.lane.b32.xlu1 %v509_v55, 256 }
 0x143   :  { %504 = vbcast.lane.b32.xlu0 %v502_v56, 256 }
 0x1aa   :  { %v431_v63 = vpop.xlane.xlu0 %430 }
 0x1ab   :  { %v1442_v1 = vadd.f32 %v463_v59, %v431_v63 }
 0x1ad   :  { %v437_v2 = vpop.xlane.xlu1 %436  ;;  %538 = vperm.xlu0 %1067, %v1442_v1  }
 0x1ae   :  { %v434_v6 = vpop.xlane.xlu0 %433  ;;  %v523_v12 = vadd.f32 %v477_v58, %v437_v2 }
 0x1af   :  { %v522_v8 = vadd.f32 %v470_v57, %v434_v6 }
 0x1b1   :  { %v440_v9 = vpop.xlane.xlu1 %439  ;;  %541 = vperm.xlu1 %1068, %v522_v8  }
 0x1b2   :  { %v1445_v11 = vadd.f32 %v484_v60, %v440_v9  ;;  %v443_v17 = vpop.xlane.xlu0 %442 }
 0x1b3   :  { %v525_v24 = vadd.f32 %v491_v61, %v443_v17 }
 0x1b4   :  { %547 = vperm.xlu0 %1067, %v1445_v11  }
 0x1b5   :  { %v446_v16 = vpop.xlane.xlu1 %445  ;;  %544 = vperm.xlu1 %1068, %v523_v12  }
 0x1b6   :  { %v1448_v21 = vadd.f32 %v498_v62, %v446_v16  ;;  %v449_v23 = vpop.xlane.xlu0 %448 }
 0x1b8   :  { %553 = vperm.xlu0 %1067, %v1448_v21  }
 0x1b9   :  { %v452_v26 = vpop.xlane.xlu1 %451  ;;  %550 = vperm.xlu1 %1068, %v525_v24  }
 0x1ba   :  { %v505_v28 = vpop.permute.xlu0 %504 }
 0x1bb   :  { %v1451_v30 = vadd.f32 %v505_v28, %v449_v23 }
 0x1bd   :  { %v512_v31 = vpop.permute.xlu1 %511  ;;  %556 = vperm.xlu1 %1068, %v1451_v30  }
 0x1be   :  { %v1454_v32 = vadd.f32 %v512_v31, %v452_v26 }
 0x1c0   :  { %559 = vperm.xlu0 %1067, %v1454_v32  }
 0x228   :  { %v539_v36 = vpop.permute.xlu0 %538 }
 0x229   :  { %v566_v39 = vrot.slane %v539_v36, %v1459_v35 }
 0x22c   :  { %v542_v37 = vpop.permute.xlu1 %541 }
 0x22d   :  { %v570_v34 = vrot.slane %v542_v37, %v1459_v35 }
 0x22f   :  { %v548_v38 = vpop.permute.xlu0 %547  ;;  %v596_v42 = vsel %vm595_vm3, %v570_v34, %v566_v39 }
 0x230   :  { %v545_v40 = vpop.permute.xlu1 %544  ;;  %v578_v0 = vrot.slane %v548_v38, %v1459_v35 }
 0x231   :  { %v574_v41 = vrot.slane %v545_v40, %v1459_v35 }
 0x233   :  { %v598_v43 = vsel %vm597_vm4, %v574_v41, %v596_v42  ;;  %v554_v44 = vpop.permute.xlu0 %553 }
 0x234   :  { %v551_v4 = vpop.permute.xlu1 %550  ;;  %v600_v46 = vsel %vm599_vm5, %v578_v0, %v598_v43  ;;  %v586_v48 = vrot.slane %v554_v44, %v1459_v35 }
 0x235   :  { %v582_v45 = vrot.slane %v551_v4, %v1459_v35 }
 0x237   :  { %v602_v47 = vsel %vm601_vm6, %v582_v45, %v600_v46 }
 0x238   :  { %v557_v49 = vpop.permute.xlu1 %556  ;;  %v604_v51 = vsel %vm603_vm7, %v586_v48, %v602_v47 }
 0x239   :  { %v590_v50 = vrot.slane %v557_v49, %v1459_v35 }
 0x23b   :  { %v560_v52 = vpop.permute.xlu0 %559  ;;  %v606_v55 = vsel %vm605_vm8, %v590_v50, %v604_v51 }
 0x23c   :  { %v594_v56 = vrot.slane %v560_v52, %v1459_v35 }
 0x23e   :  { %v608_v57 = vsel %vm607_vm9, %v594_v56, %v606_v55 }
 0x23f   :  { %v611_v58 = vsel %vm610_vm10, %v608_v57, -inf }
 0x240   :  { %612 = vmax.xlane.f32.xlu1 %v611_v58 }
 0x2c9   :  { %v613_v59 = vpop.xlane.xlu1 %612 }
 0x2ca   :  { %v618_v60 = vrot.slane %v613_v59, %v1365_v15  ;;  %v622_v61 = vrot.slane %v613_v59, %v1360_v13  ;;  %v626_v62 = vrot.slane %v613_v59, %v1372_v18  ;;  %v630_v9 = vrot.slane %v613_v59, %v1393_v25 }
 0x2cb   :  { %v634_v23 = vrot.slane %v613_v59, %v1377_v19  ;;  %v638_v31 = vrot.slane %v613_v59, %v1406_v29  ;;  %v646_v34 = vrot.slane %v613_v59, %v1433_v53 }
 0x2cc   :  { %v655_v63 = vsub.f32 %v1442_v1, %v618_v60  ;;  %v656_v2 = vsub.f32 %v522_v8, %v622_v61  ;;  %v657_v17 = vsub.f32 %v523_v12, %v626_v62  ;;  %v658_v26 = vsub.f32 %v1445_v11, %v630_v9 }
 0x2cd   :  { %v659_v33 = vsub.f32 %v525_v24, %v634_v23  ;;  %v642_v1 = vrot.slane %v613_v59, %v1436_v54  ;;  %v660_v8 = vsub.f32 %v1448_v21, %v638_v31  ;;  %v662_v24 = vsub.f32 %v1454_v32, %v646_v34 }
 0x2ce   :  { %v663_v6 = vmul.f32 1.442695, %v655_v63  ;;  %v665_v16 = vmul.f32 1.442695, %v656_v2  ;;  %v667_v28 = vmul.f32 1.442695, %v657_v17 }
 0x2cf   :  { %v669_v36 = vmul.f32 1.442695, %v658_v26  ;;  %v671_v37 = vmul.f32 1.442695, %v659_v33  ;;  %v661_v11 = vsub.f32 %v1451_v30, %v642_v1  ;;  %v673_v38 = vmul.f32 1.442695, %v660_v8 }
 0x2d0   :  { %1085 = vpow2.f32 %v663_v6  ;;  %v677_v41 = vmul.f32 1.442695, %v662_v24 }
 0x2d1   :  { %1087 = vpow2.f32 %v665_v16  ;;  %v675_v21 = vmul.f32 1.442695, %v661_v11 }
 0x2d2   :  { %1089 = vpow2.f32 %v667_v28 }
 0x2d3   :  { %1091 = vpow2.f32 %v669_v36 }
 0x2d4   :  { %1093 = vpow2.f32 %v671_v37 }
 0x2d5   :  { %1095 = vpow2.f32 %v673_v38 }
 0x2d6   :  { %1097 = vpow2.f32 %v675_v21 }
 0x2d7   :  { %1099 = vpow2.f32 %v677_v41 }
 0x2dd   :  { %v1487_v12 = vpop.eup %1085 }
 0x2de   :  { %688 = vperm.xlu0 %1067, %v1487_v12   ;;  %v1492_v39 = vpop.eup %1087 }
 0x2df   :  { %v1496_v40 = vpop.eup %1089 }
 0x2e0   :  { %v1499_v42 = vpop.eup %1091 }
 0x2e1   :  { %v1094_v30 = vpop.eup %1093 }
 0x2e2   :  { %691 = vperm.xlu0 %1067, %v1492_v39   ;;  %v1502_v43 = vpop.eup %1095 }
 0x2e3   :  { %v1505_v32 = vpop.eup %1097 }
 0x2e4   :  { %v1508_v0 = vpop.eup %1099 }
 0x2e6   :  { %694 = vperm.xlu0 %1067, %v1496_v40  }
 0x2ea   :  { %697 = vperm.xlu0 %1067, %v1499_v42  }
 0x2ee   :  { %700 = vperm.xlu0 %1067, %v1094_v30  }
 0x2f2   :  { %703 = vperm.xlu0 %1067, %v1502_v43  }
 0x2f6   :  { %706 = vperm.xlu0 %1067, %v1505_v32  }
 0x2fa   :  { %709 = vperm.xlu0 %1067, %v1508_v0  }
 0x359   :  { %v689_v4 = vpop.permute.xlu0 %688 }
 0x35a   :  { %v714_v51 = vrot.slane %v689_v4, %v1459_v35 }
 0x35d   :  { %v692_v44 = vpop.permute.xlu0 %691 }
 0x35e   :  { %v718_v49 = vrot.slane %v692_v44, %v1459_v35 }
 0x360   :  { %v743_v57 = vsel %vm595_vm3, %v718_v49, %v714_v51 }
 0x361   :  { %v695_v45 = vpop.permute.xlu0 %694 }
 0x362   :  { %v722_v50 = vrot.slane %v695_v45, %v1459_v35 }
 0x364   :  { %v744_v59 = vsel %vm597_vm4, %v722_v50, %v743_v57 }
 0x365   :  { %v698_v46 = vpop.permute.xlu0 %697 }
 0x366   :  { %v726_v52 = vrot.slane %v698_v46, %v1459_v35 }
 0x368   :  { %v745_v61 = vsel %vm599_vm5, %v726_v52, %v744_v59 }
 0x369   :  { %v701_v47 = vpop.permute.xlu0 %700 }
 0x36a   :  { %v730_v55 = vrot.slane %v701_v47, %v1459_v35 }
 0x36c   :  { %v746_v62 = vsel %vm601_vm6, %v730_v55, %v745_v61 }
 0x36d   :  { %v704_v48 = vpop.permute.xlu0 %703 }
 0x36e   :  { %v734_v58 = vrot.slane %v704_v48, %v1459_v35 }
 0x370   :  { %v747_v2 = vsel %vm603_vm7, %v734_v58, %v746_v62 }
 0x371   :  { %v707_v56 = vpop.permute.xlu0 %706 }
 0x372   :  { %v738_v60 = vrot.slane %v707_v56, %v1459_v35 }
 0x374   :  { %v748_v9 = vsel %vm605_vm8, %v738_v60, %v747_v2 }
 0x375   :  { %v710_v63 = vpop.permute.xlu0 %709 }
 0x376   :  { %v742_v6 = vrot.slane %v710_v63, %v1459_v35 }
 0x378   :  { %v749_v17 = vsel %vm607_vm9, %v742_v6, %v748_v9 }
 0x379   :  { %v751_v16 = vsel %vm610_vm10, %v749_v17, 0.0 }
 0x37a   :  { %752 = vadd.xlane.f32.xlu0 %v751_v16 }
 0x403   :  { %v753_v23 = vpop.xlane.xlu0 %752 }
 0x404   :  { %v774_v26 = vrot.slane %v753_v23, %v1377_v19  ;;  %v758_v28 = vrot.slane %v753_v23, %v1365_v15  ;;  %v762_v31 = vrot.slane %v753_v23, %v1360_v13  ;;  %v766_v33 = vrot.slane %v753_v23, %v1372_v18 }
 0x405   :  { %v770_v36 = vrot.slane %v753_v23, %v1393_v25  ;;  %v778_v1 = vrot.slane %v753_v23, %v1406_v29  ;;  %v782_v15 = vrot.slane %v753_v23, %v1436_v54  ;;  %v786_v18 = vrot.slane %v753_v23, %v1433_v53 }
 0x406   :  { %1101 = vrcp.f32 %v774_v26 }
 0x407   :  { %1103 = vrcp.f32 %v758_v28 }
 0x408   :  { %1105 = vrcp.f32 %v762_v31 }
 0x409   :  { %1107 = vrcp.f32 %v766_v33 }
 0x40a   :  { %1109 = vrcp.f32 %v770_v36 }
 0x40b   :  { %1111 = vrcp.f32 %v778_v1 }
 0x40c   :  { %1113 = vrcp.f32 %v782_v15 }
 0x40d   :  { %1115 = vrcp.f32 %v786_v18 }
 0x413   :  { %v1102_v8 = vpop.eup %1101 }
 0x414   :  { %v1104_v37 = vpop.eup %1103  ;;  %v804_v34 = vmul.f32 %v1102_v8, %v1094_v30 }
 0x415   :  { %v796_v19 = vmul.f32 %v1104_v37, %v1487_v12  ;;  %v1106_v13 = vpop.eup %1105 }
 0x416   :  { %832 = vperm.xlu0 %1067, %v804_v34   ;;  %v798_v11 = vmul.f32 %v1106_v13, %v1492_v39  ;;  %v1108_v25 = vpop.eup %1107 }
 0x417   :  { %820 = vperm.xlu1 %1068, %v796_v19   ;;  %v800_v29 = vmul.f32 %v1108_v25, %v1496_v40  ;;  %v1110_v38 = vpop.eup %1109 }
 0x418   :  { %v802_v12 = vmul.f32 %v1110_v38, %v1499_v42  ;;  %v1112_v24 = vpop.eup %1111 }
 0x419   :  { %v806_v54 = vmul.f32 %v1112_v24, %v1502_v43  ;;  %v1114_v21 = vpop.eup %1113 }
 0x41a   :  { %v808_v39 = vmul.f32 %v1114_v21, %v1505_v32  ;;  %v1116_v41 = vpop.eup %1115 }
 0x41b   :  { %823 = vperm.xlu1 %1068, %v798_v11   ;;  %v810_v53 = vmul.f32 %v1116_v41, %v1508_v0 }
 0x41f   :  { %826 = vperm.xlu1 %1068, %v800_v29  }
 0x423   :  { %829 = vperm.xlu1 %1068, %v802_v12  }
 0x427   :  { %835 = vperm.xlu1 %1068, %v806_v54  }
 0x42b   :  { %838 = vperm.xlu1 %1068, %v808_v39  }
 0x42f   :  { %841 = vperm.xlu1 %1068, %v810_v53  }
 0x491   :  { %v833_v42 = vpop.permute.xlu0 %832 }
 0x492   :  { %v821_v30 = vpop.permute.xlu1 %820  ;;  %v896_v47 = vmul.f32 %v833_v42, %v1386_v22  ;;  %v862_v19 = vrot.slane %v833_v42, %v1459_v35 }
 0x493   :  { %v892_v40 = vmul.f32 %v821_v30, %v1353_v7  ;;  %v846_v63 = vrot.slane %v821_v30, %v1459_v35 }
 0x494   :  { %v928_v7 = vsel %vm101_vm0, %v896_v47, 0.0 }
 0x495   :  { %v900_v4 = vsel %vm101_vm0, %v892_v40, 0.0  ;;  %v929_v57 = vrot.slane %v928_v7, 4 }
 0x496   :  { %v824_v44 = vpop.permute.xlu1 %823  ;;  %v901_v46 = vrot.slane %v900_v4, 4 }
 0x497   :  { %v893_v45 = vmul.f32 %v824_v44, %v1357_v10  ;;  %v850_v59 = vrot.slane %v824_v44, %v1459_v35  ;;  %v930_v17 = vadd.f32 %v929_v57, %v928_v7 }
 0x498   :  { %v902_v0 = vadd.f32 %v901_v46, %v900_v4 }
 0x499   :  { %v907_v43 = vsel %vm101_vm0, %v893_v45, 0.0  ;;  %v875_v23 = vsel %vm595_vm3, %v850_v59, %v846_v63  ;;  %v931_v18 = vrot.slane %v930_v17, 2 }
 0x49a   :  { %v908_v32 = vrot.slane %v907_v43, 4  ;;  %v827_v48 = vpop.permute.xlu1 %826  ;;  %v903_v58 = vrot.slane %v902_v0, 2 }
 0x49b   :  { %v894_v49 = vmul.f32 %v827_v48, %v1362_v14  ;;  %v854_v14 = vrot.slane %v827_v48, %v1459_v35  ;;  %v932_v42 = vadd.f32 %v931_v18, %v930_v17 }
 0x49c   :  { %v909_v51 = vadd.f32 %v908_v32, %v907_v43  ;;  %v904_v16 = vadd.f32 %v903_v58, %v902_v0 }
 0x49d   :  { %v914_v50 = vsel %vm101_vm0, %v894_v49, 0.0  ;;  %v876_v31 = vsel %vm597_vm4, %v854_v14, %v875_v23 }
 0x49e   :  { %v915_v52 = vrot.slane %v914_v50, 4  ;;  %v830_v55 = vpop.permute.xlu1 %829  ;;  %v910_v60 = vrot.slane %v909_v51, 2  ;;  %v905_v25 = vrot.slane %v904_v16, 1 }
 0x49f   :  { %v895_v56 = vmul.f32 %v830_v55, %v1381_v20  ;;  %v858_v6 = vrot.slane %v830_v55, %v1459_v35 }
 0x4a0   :  { %v916_v10 = vadd.f32 %v915_v52, %v914_v50  ;;  %v911_v28 = vadd.f32 %v910_v60, %v909_v51  ;;  %v906_v48 = vadd.f32 %v905_v25, %v904_v16 }
 0x4a1   :  { %v921_v22 = vsel %vm101_vm0, %v895_v56, 0.0  ;;  %v877_v37 = vsel %vm599_vm5, %v858_v6, %v876_v31 }
 0x4a2   :  { %v922_v61 = vrot.slane %v921_v22, 4  ;;  %v836_v62 = vpop.permute.xlu1 %835  ;;  %v917_v2 = vrot.slane %v916_v10, 2  ;;  %v912_v38 = vrot.slane %v911_v28, 1  ;;  %v878_v12 = vsel %vm601_vm6, %v862_v19, %v877_v37 }
 0x4a3   :  { %v897_v9 = vmul.f32 %v836_v62, %v1401_v27  ;;  %v866_v34 = vrot.slane %v836_v62, %v1459_v35 }
 0x4a4   :  { %v923_v20 = vadd.f32 %v922_v61, %v921_v22  ;;  %v918_v8 = vadd.f32 %v917_v2, %v916_v10  ;;  %v913_v43 = vadd.f32 %v912_v38, %v911_v28 }
 0x4a5   :  { %v935_v26 = vsel %vm101_vm0, %v897_v9, 0.0 }
 0x4a6   :  { %v924_v33 = vrot.slane %v923_v20, 2  ;;  %v936_v36 = vrot.slane %v935_v26, 4  ;;  %v839_v1 = vpop.permute.xlu1 %838  ;;  %v919_v39 = vrot.slane %v918_v8, 1 }
 0x4a7   :  { %v898_v27 = vmul.f32 %v839_v1, %v1344_v3  ;;  %v870_v11 = vrot.slane %v839_v1, %v1459_v35  ;;  %v879_v3 = vsel %vm603_vm7, %v866_v34, %v878_v12 }
 0x4a8   :  { %v925_v15 = vadd.f32 %v924_v33, %v923_v20  ;;  %v937_v13 = vadd.f32 %v936_v36, %v935_v26 }
 0x4a9   :  { %v942_v29 = vsel %vm101_vm0, %v898_v27, 0.0  ;;  %v880_v44 = vsel %vm605_vm8, %v870_v11, %v879_v3 }
 0x4aa   :  { %v938_v24 = vrot.slane %v937_v13, 2  ;;  %v943_v54 = vrot.slane %v942_v29, 4  ;;  %v842_v21 = vpop.permute.xlu1 %841  ;;  %v926_v30 = vrot.slane %v925_v15, 1 }
 0x4ab   :  { %v874_v41 = vrot.slane %v842_v21, %v1459_v35  ;;  %v899_v53 = vmul.f32 %v842_v21, %v1351_v5  ;;  %v920_v35 = vadd.f32 %v919_v39, %v918_v8 }
 0x4ac   :  { %v939_v40 = vadd.f32 %v938_v24, %v937_v13  ;;  %v944_v4 = vadd.f32 %v943_v54, %v942_v29 }
 0x4ad   :  { %v949_v45 = vsel %vm101_vm0, %v899_v53, 0.0  ;;  %v881_v46 = vsel %vm607_vm9, %v874_v41, %v880_v44 }
 0x4ae   :  { %v945_v47 = vrot.slane %v944_v4, 2  ;;  %v950_v32 = vrot.slane %v949_v45, 4  ;;  %883 = vst.msk [vmem:[#allocation12] sm:$0xff] %vm610_vm10, %v881_v46 }
 0x4af   :  { %1228 = shalt.err (!%p1225_p1)
}
 0x4b0   :  { %992 = dma.vmem_to_hbm [thread:$0]  %s990_s25, 128, %s1595_s7, [#allocation13]   ;;  %v927_v5 = vadd.f32 %v926_v30, %v925_v15  ;;  %v940_v49 = vrot.slane %v939_v40, 1  ;;  %v946_v0 = vadd.f32 %v945_v47, %v944_v4  ;;  %v951_v50 = vadd.f32 %v950_v32, %v949_v45 }
 0x4b1   :  { %v933_v7 = vrot.slane %v932_v42, 1  ;;  %v964_v51 = vsel %vm595_vm3, %v913_v43, %v906_v48  ;;  %s1279_s29 = smov [#allocation11]  }
 0x4b2   :  { %v947_v52 = vrot.slane %v946_v0, 1  ;;  %v952_v55 = vrot.slane %v951_v50, 2  ;;  %v965_v56 = vsel %vm597_vm4, %v920_v35, %v964_v51  ;;  %v941_v10 = vadd.f32 %v940_v49, %v939_v40  ;;  %s979_s7 = sshll.u32 %s1279_s29, 4  ;;  %s980_s7 = int_to_ptr.vmem [resolvable:$true] %s979_s7 }
 0x4b3   :  { %v966_v58 = vsel %vm599_vm5, %v927_v5, %v965_v56  ;;  %v934_v59 = vadd.f32 %v933_v7, %v932_v42  ;;  %s1237_s30 = scalar_lea.vmem %s980_s7, 128  ;;  %p1242_p3 = scmp.lt.s32.totalorder %s980_s7, %s980_s7 }
 0x4b4   :  { %v953_v57 = vadd.f32 %v952_v55, %v951_v50  ;;  %v948_v22 = vadd.f32 %v947_v52, %v946_v0  ;;  %p1238_p2 = scmp.ne.s32.totalorder %s980_s7, %s1237_s30  ;;  %p1243_p4 = scmp.lt.s32.totalorder %s1237_s30, %s1237_s30 }
 0x4b5   :  { %v967_v14 = vsel %vm601_vm6, %v934_v59, %v966_v58 }
 0x4b6   :  { %v954_v60 = vrot.slane %v953_v57, 1  ;;  %v968_v62 = vsel %vm603_vm7, %v941_v10, %v967_v14  ;;  %p1244_p5 = por %p1243_p4, %p1242_p3 }
 0x4b7   :  { %v969_v63 = vsel %vm605_vm8, %v948_v22, %v968_v62 }
 0x4b8   :  { %v955_v61 = vadd.f32 %v954_v60, %v953_v57  ;;  %p1245_p6 = pnand %p1244_p5, %p1238_p2 }
 0x4ba   :  { %v970_v2 = vsel %vm607_vm9, %v955_v61, %v969_v63 }
 0x4bb   :  { %972 = vst.msk [vmem:[#allocation11] sm:$0xff] %vm101_vm0, %v970_v2 }
 0x4bc   :  { %1248 = shalt.err (!%p1245_p6)
}
 0x4bd   :  { %982 = dma.vmem_to_hbm [thread:$0]  %s980_s7, 128, %s1594_s6, [#allocation4]  }
 0x4be   :  { %1263 = dma.done.wait [#allocation4], 128  }
 0x4bf   :  { %1264 = vsyncadd [#allocation4], 4294967168 }
 0x4c0   :  { %1265 = dma.done.wait [#allocation13], 128  }
 0x4c1   :  { %1266 = vsyncadd [#allocation13], 4294967168 }
 0x4c2   :  { %999 = vsyncpa [#allocation3], 1 }
 0x4c3   :  { %1000 = vsyncpa [#allocation6], 1 }
 0x4c4   :  { %1001 = vsyncpa [#allocation9], 1 }
 0x4c5   :  { %1002 = vsyncpa [#allocation4], 1 }
 0x4c6   :  { %1003 = vsyncpa [#allocation13], 1 }

</bundles_post_ra>
